<compile_context>
chip_gen: v5e
topology: v5e:2x2
jax: 0.10.0
libtpu: 0.0.40
codegen_flags: <defaults>
</compile_context>

<pallas_src>
import jax
import jax.numpy as jnp
from jax.experimental import pallas as pl
from jax.experimental.pallas import tpu as pltpu


def _unpool_kernel(x_ref, o_ref):
    # x_ref / o_ref: [T, H, Wl] with H even, window pairs adjacent along both trailing axes.
    x = x_ref[...].astype(jnp.float32)
    T, H, Wl = x.shape

    # Parity masks for window position (a=(even,even), b=(even,odd), c=(odd,even), d=(odd,odd)).
    row_odd = (jax.lax.broadcasted_iota(jnp.int32, (T, H, Wl), 1) & 1) == 1
    col_odd = (jax.lax.broadcasted_iota(jnp.int32, (T, H, Wl), 2) & 1) == 1

    def lane_partner(v):
        # out[..., j] = v[..., j ^ 1]  (horizontal neighbor inside the 2x2 window)
        nxt = jnp.roll(v, -1, axis=2)   # out[j] = v[j+1]
        prv = jnp.roll(v, 1, axis=2)    # out[j] = v[j-1]
        return jnp.where(col_odd, prv, nxt)

    def sublane_partner(v):
        # out[..., i, :] = v[..., i ^ 1, :]  (vertical neighbor inside the 2x2 window)
        nxt = jnp.roll(v, -1, axis=1)
        prv = jnp.roll(v, 1, axis=1)
        return jnp.where(row_odd, prv, nxt)

    h = lane_partner(x)        # horizontal window neighbor
    v = sublane_partner(x)     # vertical window neighbor
    dg = sublane_partner(h)    # diagonal window neighbor

    # Window max, broadcast to all 4 positions of the window.
    m = jnp.maximum(jnp.maximum(x, h), jnp.maximum(v, dg))

    # "First max" tie-break (window row-major order a, b, c, d):
    #   a: nothing earlier
    #   b: a (= horizontal partner) is earlier
    #   c: a (= vertical), b (= diagonal) are earlier
    #   d: a (= diagonal), b (= vertical), c (= horizontal) are earlier
    earlier_has_max = (col_odd & (h == m)) | (row_odd & ((v == m) | (dg == m)))
    keep = (x == m) & jnp.logical_not(earlier_has_max)

    o_ref[...] = jnp.where(keep, x, 0.0).astype(o_ref.dtype)


def unpooling_net(x):
    """x: [N, C, H, W]. Returns MaxUnpool2d(2)(*MaxPool2d(2, return_indices=True)(x))."""
    N, C, H, W = x.shape
    assert H % 2 == 0 and W % 2 == 0
    NC = N * C

    # Fold as many channel-images as possible onto the 128-lane axis (lane-dense output).
    # 2x2 windows never cross the W-wide sub-groups (W is even), so parity logic is unchanged.
    max_fold = max(1, 128 // W)
    fold = 1
    for f in range(min(NC, max_fold), 0, -1):
        if NC % f == 0:
            fold = f
            break
    G = NC // fold
    Wl = fold * W

    # [N, C, H, W] -> [G, fold, H, W] -> [G, H, fold, W] -> [G, H, fold*W]
    x_slab = x.reshape(G, fold, H, W).transpose(0, 2, 1, 3).reshape(G, H, Wl)

    # Tile over the leading axis. Cap tile so double-buffered in+out stays well under the
    # scoped VMEM default on every generation (v7x has only 64 MiB physical / 32 MiB scoped).
    bytes_per_row = H * Wl * jnp.dtype(x.dtype).itemsize
    max_t = max(1, min(512, (4 * 1024 * 1024) // max(1, bytes_per_row)))
    T = 1
    for t in range(min(G, max_t), 0, -1):
        if G % t == 0:
            T = t
            break

    out_slab = pl.pallas_call(
        _unpool_kernel,
        out_shape=jax.ShapeDtypeStruct((G, H, Wl), x.dtype),
        grid=(G // T,),
        in_specs=[pl.BlockSpec((T, H, Wl), lambda i: (i, 0, 0))],
        out_specs=pl.BlockSpec((T, H, Wl), lambda i: (i, 0, 0)),
        compiler_params=pltpu.CompilerParams(
            dimension_semantics=("parallel",),  # shards across both TCs on v7x
        ),
    )(x_slab)

    out = out_slab.reshape(G, H, fold, W).transpose(0, 2, 1, 3).reshape(N, C, H, W)
    return out


def _reference(x):
    """Pure-JAX reference of MaxPool2d(2)->MaxUnpool2d(2) with first-max tie-break."""
    N, C, H, W = x.shape
    xr = x.reshape(N, C, H // 2, 2, W // 2, 2)
    win = xr.transpose(0, 1, 2, 4, 3, 5).reshape(N, C, H // 2, W // 2, 4)
    idx = jnp.argmax(win, axis=-1)  # first max -> matches PyTorch tie-break
    onehot = jax.nn.one_hot(idx, 4, dtype=x.dtype)
    kept = win * onehot
    out = kept.reshape(N, C, H // 2, W // 2, 2, 2).transpose(0, 1, 2, 4, 3, 5)
    return out.reshape(N, C, H, W)


if __name__ == "__main__":
    key = jax.random.PRNGKey(0)
    x = jax.random.normal(key, (2, 4, 16, 16), dtype=jnp.float32)

    out = unpooling_net(x)
    out = jax.block_until_ready(out)

    ref = _reference(x)
    assert out.shape == x.shape and out.dtype == x.dtype
    assert jnp.allclose(out, ref, atol=1e-6), "mismatch vs reference"

    print("KERNEL_OK")
</pallas_src>

<mosaic_0001>
module attributes {stable_mosaic.version = 11 : i64} {
  func.func @_unpool_kernel(%arg0: i32, %arg1: memref<1x16x128xf32, #tpu.memory_space<vmem>>, %arg2: memref<1x16x128xf32, #tpu.memory_space<vmem>>) attributes {dimension_semantics = [#tpu.dimension_semantics<parallel>], iteration_bounds = array<i64: 1>, scalar_prefetch = 0 : i64, scratch_operands = 0 : i64, tpu.core_type = #tpu.core_type<tc>, window_params = [{transform_indices = @transform_0, window_bounds = array<i64: 1, 16, 128>}, {transform_indices = @transform_1, window_bounds = array<i64: 1, 16, 128>}]} {
    %c0 = arith.constant 0 : index
    %c0_0 = arith.constant 0 : index
    %c0_1 = arith.constant 0 : index
    %0 = vector.load %arg1[%c0, %c0_0, %c0_1] : memref<1x16x128xf32, #tpu.memory_space<vmem>>, vector<1x16x128xf32>
    %1 = tpu.iota {dimensions = array<i32: 1>} : vector<1x16x128xi32>
    %c1_i32 = arith.constant 1 : i32
    %2 = vector.broadcast %c1_i32 : i32 to vector<1x16x128xi32>
    %3 = arith.andi %1, %2 : vector<1x16x128xi32>
    %c1_i32_2 = arith.constant 1 : i32
    %4 = vector.broadcast %c1_i32_2 : i32 to vector<1x16x128xi32>
    %5 = arith.cmpi eq, %3, %4 : vector<1x16x128xi32>
    %6 = tpu.iota {dimensions = array<i32: 2>} : vector<1x16x128xi32>
    %c1_i32_3 = arith.constant 1 : i32
    %7 = vector.broadcast %c1_i32_3 : i32 to vector<1x16x128xi32>
    %8 = arith.andi %6, %7 : vector<1x16x128xi32>
    %c1_i32_4 = arith.constant 1 : i32
    %9 = vector.broadcast %c1_i32_4 : i32 to vector<1x16x128xi32>
    %10 = arith.cmpi eq, %8, %9 : vector<1x16x128xi32>
    %11 = vector.extract_strided_slice %0 {offsets = [0, 0, 1], sizes = [1, 16, 127], strides = [1, 1, 1]} : vector<1x16x128xf32> to vector<1x16x127xf32>
    %12 = vector.extract_strided_slice %0 {offsets = [0, 0, 0], sizes = [1, 16, 1], strides = [1, 1, 1]} : vector<1x16x128xf32> to vector<1x16x1xf32>
    %13 = tpu.concatenate %11, %12 in 2 : vector<1x16x127xf32>, vector<1x16x1xf32> -> vector<1x16x128xf32>
    %14 = vector.extract_strided_slice %0 {offsets = [0, 0, 127], sizes = [1, 16, 1], strides = [1, 1, 1]} : vector<1x16x128xf32> to vector<1x16x1xf32>
    %15 = vector.extract_strided_slice %0 {offsets = [0, 0, 0], sizes = [1, 16, 127], strides = [1, 1, 1]} : vector<1x16x128xf32> to vector<1x16x127xf32>
    %16 = tpu.concatenate %14, %15 in 2 : vector<1x16x1xf32>, vector<1x16x127xf32> -> vector<1x16x128xf32>
    %17 = arith.select %10, %16, %13 : vector<1x16x128xi1>, vector<1x16x128xf32>
    %18 = vector.extract_strided_slice %0 {offsets = [0, 1, 0], sizes = [1, 15, 128], strides = [1, 1, 1]} : vector<1x16x128xf32> to vector<1x15x128xf32>
    %19 = vector.extract_strided_slice %0 {offsets = [0, 0, 0], sizes = [1, 1, 128], strides = [1, 1, 1]} : vector<1x16x128xf32> to vector<1x1x128xf32>
    %20 = tpu.concatenate %18, %19 in 1 : vector<1x15x128xf32>, vector<1x1x128xf32> -> vector<1x16x128xf32>
    %21 = vector.extract_strided_slice %0 {offsets = [0, 15, 0], sizes = [1, 1, 128], strides = [1, 1, 1]} : vector<1x16x128xf32> to vector<1x1x128xf32>
    %22 = vector.extract_strided_slice %0 {offsets = [0, 0, 0], sizes = [1, 15, 128], strides = [1, 1, 1]} : vector<1x16x128xf32> to vector<1x15x128xf32>
    %23 = tpu.concatenate %21, %22 in 1 : vector<1x1x128xf32>, vector<1x15x128xf32> -> vector<1x16x128xf32>
    %24 = arith.select %5, %23, %20 : vector<1x16x128xi1>, vector<1x16x128xf32>
    %25 = vector.extract_strided_slice %17 {offsets = [0, 1, 0], sizes = [1, 15, 128], strides = [1, 1, 1]} : vector<1x16x128xf32> to vector<1x15x128xf32>
    %26 = vector.extract_strided_slice %17 {offsets = [0, 0, 0], sizes = [1, 1, 128], strides = [1, 1, 1]} : vector<1x16x128xf32> to vector<1x1x128xf32>
    %27 = tpu.concatenate %25, %26 in 1 : vector<1x15x128xf32>, vector<1x1x128xf32> -> vector<1x16x128xf32>
    %28 = vector.extract_strided_slice %17 {offsets = [0, 15, 0], sizes = [1, 1, 128], strides = [1, 1, 1]} : vector<1x16x128xf32> to vector<1x1x128xf32>
    %29 = vector.extract_strided_slice %17 {offsets = [0, 0, 0], sizes = [1, 15, 128], strides = [1, 1, 1]} : vector<1x16x128xf32> to vector<1x15x128xf32>
    %30 = tpu.concatenate %28, %29 in 1 : vector<1x1x128xf32>, vector<1x15x128xf32> -> vector<1x16x128xf32>
    %31 = arith.select %5, %30, %27 : vector<1x16x128xi1>, vector<1x16x128xf32>
    %32 = arith.maximumf %0, %17 : vector<1x16x128xf32>
    %33 = arith.maximumf %24, %31 : vector<1x16x128xf32>
    %34 = arith.maximumf %32, %33 : vector<1x16x128xf32>
    %35 = arith.cmpf oeq, %17, %34 : vector<1x16x128xf32>
    %36 = arith.andi %10, %35 : vector<1x16x128xi1>
    %37 = arith.cmpf oeq, %24, %34 : vector<1x16x128xf32>
    %38 = arith.cmpf oeq, %31, %34 : vector<1x16x128xf32>
    %39 = arith.ori %37, %38 : vector<1x16x128xi1>
    %40 = arith.andi %5, %39 : vector<1x16x128xi1>
    %41 = arith.ori %36, %40 : vector<1x16x128xi1>
    %42 = arith.cmpf oeq, %0, %34 : vector<1x16x128xf32>
    %cst = arith.constant dense<true> : vector<1x16x128xi1>
    %43 = arith.xori %41, %cst : vector<1x16x128xi1>
    %44 = arith.andi %42, %43 : vector<1x16x128xi1>
    %cst_5 = arith.constant 0.000000e+00 : f32
    %45 = vector.broadcast %cst_5 : f32 to vector<1x16x128xf32>
    %46 = arith.select %44, %0, %45 : vector<1x16x128xi1>, vector<1x16x128xf32>
    %c0_6 = arith.constant 0 : index
    %c0_7 = arith.constant 0 : index
    %c0_8 = arith.constant 0 : index
    %47 = vector.load %arg2[%c0_6, %c0_7, %c0_8] : memref<1x16x128xf32, #tpu.memory_space<vmem>>, vector<1x16x128xf32>
    tpu.vector_store %arg2[%c0_6, %c0_7, %c0_8], %46 {strides = array<i32>} : memref<1x16x128xf32, #tpu.memory_space<vmem>>, vector<1x16x128xf32>,
    return
  }
  func.func @transform_0(%arg0: i32) -> (i32, i32, i32) {
    %c0_i32 = arith.constant 0 : i32
    %c0_i32_0 = arith.constant 0 : i32
    %c0_i32_1 = arith.constant 0 : i32
    return %arg0, %c0_i32, %c0_i32_0 : i32, i32, i32
  }
  func.func @transform_1(%arg0: i32) -> (i32, i32, i32) {
    %c0_i32 = arith.constant 0 : i32
    %c0_i32_0 = arith.constant 0 : i32
    %c0_i32_1 = arith.constant 0 : i32
    return %arg0, %c0_i32, %c0_i32_0 : i32, i32, i32
  }
}

</mosaic_0001>

<bundles_post_ra>
// kernel: tpu_custom_call.1
= control target key start
LH: loop header
LB: loop body
LE: loop exit
PB: predicated region body
PF: predicated region fallthrough
CT: control target
= control target key end

     0   :  { %6 = vsyncpa [#allocation3], 0  ;;  %s285_s0 = inlined_call_operand.hbm [shape: f32[1,16,128], index: 0, kind: input, shape index: {}]   ;;  %s286_s1 = inlined_call_operand.hbm [shape: f32[1,16,128], index: 1, kind: output, shape index: {}]  }
   0x1   :  { %7 = vsyncpa [#allocation4], 0  ;;  %s12_s8 = sshll.u32 %s285_s0, 4  ;;  %s198_s9 = smov [#allocation2]   ;;  %s13_s8 = int_to_ptr.hbm [resolvable:$true] %s12_s8 }
   0x2   :  { %s14_s10 = sshll.u32 %s198_s9, 4  ;;  %s199_s11 = smov 128   ;;  %s15_s10 = int_to_ptr.vmem [resolvable:$true] %s14_s10 }
   0x3   :  { %s200_s12 = smov 8  }
   0x4   :  { %20 = dma.hbm_to_vmem [thread:$0]  %s13_s8, 256, %s15_s10, [#allocation3], %s199_s11, %s199_s11, %s200_s12  }
   0x5   :  { %194 = dma.done.wait [#allocation3], 256  }
   0x6   :  { %195 = vsyncadd [#allocation3], 4294967040  ;;  %v221_v0 = vld [vmem:[#allocation2] sm:$0xff]  ;;  %s201_s13 = smov 1   ;;  %s202_s14 = smov 127   ;;  %v225_v1 = vld [vmem:[#allocation2 + $0x8] sm:$0xff]  ;;  %v27_v2 = vlaneseq }
   0x7   :  { %46 = vrot.lane.b32.xlu1 %v221_v0, %s201_s13  ;;  %40 = vrot.lane.b32.xlu0 %v221_v0, %s202_s14  ;;  %v56_v11 = vrot.slane %v225_v1, 1  ;;  %v55_v12 = vrot.slane %v221_v0, 1  ;;  %vm54_vm1 = vcmask 1046528   ;;  %v62_v14 = vrot.slane %v225_v1, 7  ;;  %s204_s0 = smov [#allocation5]   ;;  %s126_s18 = sshll.u32 %s286_s1, 4  ;;  %s127_s18 = int_to_ptr.hbm [resolvable:$true] %s126_s18 }
   0x8   :  { %v35_v3 = vand.u32 127, %v27_v2  ;;  %v28_v4 = vshrl.u32 %v27_v2, 7  ;;  %v65_v15 = vrot.slane %v221_v0, 7  ;;  %vm64_vm2 = vcmask 1040384   ;;  %s124_s15 = sshll.u32 %s204_s0, 4  ;;  %s125_s15 = int_to_ptr.vmem [resolvable:$true] %s124_s15 }
   0x9   :  { %v57_v18 = vsel %vm54_vm1, %v55_v12, %v56_v11  ;;  %v61_v22 = vsel %vm54_vm1, %v56_v11, %v55_v12 }
   0xa   :  { %v36_v5 = vand.u32 1, %v35_v3  ;;  %v29_v8 = vadd.s32 8, %v28_v4  ;;  %v30_v9 = vand.u32 1, %v28_v4  ;;  %v66_v23 = vsel %vm64_vm2, %v65_v15, %v62_v14 }
   0xb   :  { %v69_v24 = vsel %vm64_vm2, %v62_v14, %v65_v15 }
   0xc   :  { %vm229_vm0 = vcmp.eq.s32.totalorder %v36_v5, 1  ;;  %v31_v13 = vand.u32 1, %v29_v8  ;;  %vm237_vm3 = vcmp.eq.s32.totalorder %v30_v9, 1 }
   0xd   :  { %v70_v30 = vsel %vm237_vm3, %v69_v24, %v57_v18 }
   0xe   :  { %vm244_vm4 = vcmp.eq.s32.totalorder %v31_v13, 1 }
   0xf   :  { %48 = vrot.lane.b32.xlu1 %v225_v1, %s201_s13  ;;  %42 = vrot.lane.b32.xlu0 %v225_v1, %s202_s14  ;;  %v71_v31 = vsel %vm244_vm4, %v66_v23, %v61_v22 }
  0x79   :  { %v47_v6 = vpop.permute.xlu1 %46  ;;  %v41_v7 = vpop.permute.xlu0 %40 }
  0x7a   :  { %v52_v17 = vsel %vm229_vm0, %v47_v6, %v41_v7 }
  0x7b   :  { %v74_v26 = vrot.slane %v52_v17, 1  ;;  %v83_v27 = vrot.slane %v52_v17, 7  ;;  %v90_v38 = vmax.f32 %v221_v0, %v52_v17 }
  0x81   :  { %v49_v19 = vpop.permute.xlu1 %48  ;;  %v43_v21 = vpop.permute.xlu0 %42 }
  0x82   :  { %v53_v25 = vsel %vm229_vm0, %v49_v19, %v43_v21 }
  0x83   :  { %v75_v28 = vrot.slane %v53_v25, 1  ;;  %v81_v29 = vrot.slane %v53_v25, 7  ;;  %v91_v39 = vmax.f32 %v225_v1, %v53_v25 }
  0x85   :  { %v76_v32 = vsel %vm54_vm1, %v74_v26, %v75_v28  ;;  %v80_v33 = vsel %vm54_vm1, %v75_v28, %v74_v26  ;;  %v84_v34 = vsel %vm64_vm2, %v83_v27, %v81_v29  ;;  %v87_v35 = vsel %vm64_vm2, %v81_v29, %v83_v27 }
  0x86   :  { %v88_v36 = vsel %vm237_vm3, %v87_v35, %v76_v32  ;;  %v89_v37 = vsel %vm244_vm4, %v84_v34, %v80_v33 }
  0x87   :  { %v92_v40 = vmax.f32 %v70_v30, %v88_v36  ;;  %v93_v41 = vmax.f32 %v71_v31, %v89_v37 }
  0x89   :  { %v94_v42 = vmax.f32 %v90_v38, %v92_v40  ;;  %v95_v43 = vmax.f32 %v91_v39, %v93_v41 }
  0x8b   :  { %vm97_vm5 = vcmp.eq.f32.partialorder %v53_v25, %v95_v43  ;;  %vm101_vm6 = vcmp.eq.f32.partialorder %v71_v31, %v95_v43  ;;  %vm103_vm7 = vcmp.eq.f32.partialorder %v89_v37, %v95_v43  ;;  %vm96_vm10 = vcmp.eq.f32.partialorder %v52_v17, %v94_v42 }
  0x8c   :  { %vm99_vm8 = vmand %vm229_vm0, %vm97_vm5  ;;  %vm100_vm12 = vcmp.eq.f32.partialorder %v70_v30, %v94_v42  ;;  %vm102_vm13 = vcmp.eq.f32.partialorder %v88_v36, %v94_v42 }
  0x8d   :  { %vm105_vm9 = vmor %vm101_vm6, %vm103_vm7  ;;  %vm203_vm6 = vmmov 1  }
  0x8e   :  { %vm107_vm11 = vmand %vm244_vm4, %vm105_vm9  ;;  %vm110_vm4 = vcmp.eq.f32.partialorder %v221_v0, %v94_v42 }
  0x8f   :  { %vm109_vm14 = vmor %vm99_vm8, %vm107_vm11  ;;  %vm111_vm8 = vcmp.eq.f32.partialorder %v225_v1, %v95_v43 }
  0x90   :  { %vm98_vm15 = vmand %vm229_vm0, %vm96_vm10 }
  0x91   :  { %vm104_vm1 = vmor %vm100_vm12, %vm102_vm13 }
  0x92   :  { %vm106_vm2 = vmand %vm237_vm3, %vm104_vm1 }
  0x93   :  { %vm108_vm5 = vmor %vm98_vm15, %vm106_vm2 }
  0x94   :  { %vm112_vm7 = vmxor %vm108_vm5, %vm203_vm6 }
  0x95   :  { %vm113_vm9 = vmxor %vm109_vm14, %vm203_vm6 }
  0x96   :  { %vm114_vm11 = vmand %vm110_vm4, %vm112_vm7 }
  0x97   :  { %vm115_vm0 = vmand %vm111_vm8, %vm113_vm9  ;;  %v116_v44 = vsel %vm114_vm11, %v221_v0, 0.0 }
  0x98   :  { %v117_v45 = vsel %vm115_vm0, %v225_v1, 0.0  ;;  %118 = vst [vmem:[#allocation5] sm:$0xff] %v116_v44 }
  0x99   :  { %119 = vst [vmem:[#allocation5 + $0x8] sm:$0xff] %v117_v45 }
  0x9a   :  { %132 = dma.vmem_to_hbm [thread:$0]  %s125_s15, 256, %s127_s18, [#allocation4], %s199_s11, %s199_s11, %s200_s12  }
  0x9b   :  { %196 = dma.done.wait [#allocation4], 256  }
  0x9c   :  { %197 = vsyncadd [#allocation4], 4294967040 }
  0x9d   :  { %137 = vsyncpa [#allocation3], 1 }
  0x9e   :  { %138 = vsyncpa [#allocation4], 1 }

</bundles_post_ra>
